<compile_context>
chip_gen: v6e
topology: v6e:2x2x1
jax: 0.10.0
libtpu: 0.0.40
codegen_flags: <defaults>
</compile_context>

<pallas_src>
import functools

import jax
import jax.numpy as jnp
import numpy as np
from jax.experimental import pallas as pl
from jax.experimental.pallas import tpu as pltpu

MAX_LENGTH = 36
SEG = 128  # lane width of every fused-matmul output segment and of the packed output


def _attn_decoder_kernel(x_ref, h0_ref, enc_ref, w1_ref, w2_ref, b2_ref,
                         out_ref, hpad_ref, *, H, O):
    """One decode step per grid iteration; hidden state carried in hpad_ref scratch."""
    # Initialize the hidden-state scratch from the (lane-padded) initial hidden.
    @pl.when(pl.program_id(0) == 0)
    def _():
        hpad_ref[...] = h0_ref[...]

    # xh_aug = [h (lanes 0:H) | x (lanes H:H+O) | 1 (lane H+O) | 0 ...]   (1, 128)
    # (per-step input already lane-placed by the wrapper -> a single VPU add, no rotate)
    xh = hpad_ref[...] + x_ref[...]

    # Fused projection (1,128)@(128,640):
    #   seg0 = attn logits (+attn_b, -1e30 on pad lanes)
    #   seg1 = x-part of attn_combine (+comb_b)
    #   seg2/3/4 = GRU hidden->gates r/z/n (+b_hh), each starting at lane 0 of a vreg.
    proj = jnp.dot(xh, w1_ref[...], preferred_element_type=jnp.float32)

    # ---- attention softmax over segment 0 -----------------------------------
    logits = proj[:, 0:SEG]
    m = jnp.max(logits, axis=1, keepdims=True)
    e = jnp.exp(logits - m)                       # masked pad lanes underflow to 0
    s = jnp.sum(e, axis=1, keepdims=True)
    r0 = pl.reciprocal(s, approx=True)            # EUP approx ...
    inv = r0 * (2.0 - s * r0)                     # ... + one Newton step (~f32 exact)
    aw = e * inv                                  # (1, 128); lanes >= L are exactly 0

    # ---- attn_combine: comb_w's "applied" half pre-folded into enc_c --------
    comb_a = jnp.dot(aw, enc_ref[...], preferred_element_type=jnp.float32)   # (1, H)
    gx = jnp.maximum(proj[:, SEG:SEG + H] + comb_a, 0.0)                     # ReLU

    # ---- GRU cell (PyTorch gate order r, z, n); gi segments lane-0 aligned ---
    gi = (jnp.dot(gx, w2_ref[:, 0:3 * SEG], preferred_element_type=jnp.float32)
          + b2_ref[:, 0:3 * SEG])
    h = hpad_ref[:, 0:H]
    r = jax.nn.sigmoid(gi[:, 0:H] + proj[:, 2 * SEG:2 * SEG + H])
    z = jax.nn.sigmoid(gi[:, SEG:SEG + H] + proj[:, 3 * SEG:3 * SEG + H])
    n = jnp.tanh(gi[:, 2 * SEG:2 * SEG + H] + r * proj[:, 4 * SEG:4 * SEG + H])
    h_new = (1.0 - z) * n + z * h                                            # (1, H)

    # ---- out Linear + softmax -------------------------------------------------
    ologits = (jnp.dot(h_new, w2_ref[:, 3 * SEG:3 * SEG + O],
                       preferred_element_type=jnp.float32)
               + b2_ref[:, 3 * SEG:3 * SEG + O])
    m2 = jnp.max(ologits, axis=1, keepdims=True)
    e2 = jnp.exp(ologits - m2)
    s2 = jnp.sum(e2, axis=1, keepdims=True)
    r2 = pl.reciprocal(s2, approx=True)
    out_sm = e2 * (r2 * (2.0 - s2 * r2))

    # ---- packed lane-dense (1,128) per-step output: [out | h_new | attn_w | 0] --
    out_ref[:, 0:O] = out_sm
    out_ref[:, O:O + H] = h_new
    out_ref[:, O + H:SEG] = aw[:, 0:SEG - O - H]   # aw pad lanes are exactly 0

    # Carry hidden to the next grid step (lanes >= H of the scratch stay 0).
    hpad_ref[:, 0:H] = h_new


def pack_params(params):
    """One-time weight packing (hoisted out of the per-step / per-sequence path)."""
    H, O, L = params["H"], params["O"], params["L"]
    f32 = jnp.float32
    assert H + O + 1 <= SEG and L <= SEG and H <= SEG and O <= SEG
    assert O + H + L <= SEG           # packed-output lane layout

    attn_w = params["attn_w"].astype(f32)   # (L, O+H)  input order: [x | h]
    comb_w = params["comb_w"].astype(f32)   # (H, O+H)  input order: [x | applied]
    w_ih = params["w_ih"].astype(f32)       # (3H, H)   gate order r|z|n
    w_hh = params["w_hh"].astype(f32)       # (3H, H)
    out_w = params["out_w"].astype(f32)     # (O, H)

    # W1: rows [0:H] hidden weights, rows [H:H+O] x weights, row H+O = bias row.
    # Columns: 5 lane-aligned SEG-wide segments [attn | comb_x | gh_r | gh_z | gh_n].
    W1 = jnp.zeros((SEG, 5 * SEG), f32)
    W1 = W1.at[0:H, 0:L].set(attn_w[:, O:O + H].T)            # attn, hidden part
    W1 = W1.at[H:H + O, 0:L].set(attn_w[:, 0:O].T)            # attn, x part
    W1 = W1.at[H + O, 0:L].set(params["attn_b"].astype(f32))
    W1 = W1.at[H + O, L:SEG].set(-1e30)                        # softmax pad mask
    W1 = W1.at[H:H + O, SEG:SEG + H].set(comb_w[:, 0:O].T)     # attn_combine, x part
    W1 = W1.at[H + O, SEG:SEG + H].set(params["comb_b"].astype(f32))
    W1 = W1.at[0:H, 2 * SEG:2 * SEG + H].set(w_hh[0:H].T)      # gh_r
    W1 = W1.at[0:H, 3 * SEG:3 * SEG + H].set(w_hh[H:2 * H].T)  # gh_z
    W1 = W1.at[0:H, 4 * SEG:4 * SEG + H].set(w_hh[2 * H:3 * H].T)  # gh_n
    W1 = W1.at[H + O, 2 * SEG:2 * SEG + H].set(params["b_hh"][0:H].astype(f32))
    W1 = W1.at[H + O, 3 * SEG:3 * SEG + H].set(params["b_hh"][H:2 * H].astype(f32))
    W1 = W1.at[H + O, 4 * SEG:4 * SEG + H].set(params["b_hh"][2 * H:3 * H].astype(f32))

    # W2: lane-aligned segments [Wih_r | Wih_z | Wih_n | Wout]; b2 matches.
    W2 = jnp.zeros((H, 4 * SEG), f32)
    W2 = W2.at[:, 0:H].set(w_ih[0:H].T)
    W2 = W2.at[:, SEG:SEG + H].set(w_ih[H:2 * H].T)
    W2 = W2.at[:, 2 * SEG:2 * SEG + H].set(w_ih[2 * H:3 * H].T)
    W2 = W2.at[:, 3 * SEG:3 * SEG + O].set(out_w.T)
    b2 = jnp.zeros((1, 4 * SEG), f32)
    b2 = b2.at[0, 0:H].set(params["b_ih"][0:H].astype(f32))
    b2 = b2.at[0, SEG:SEG + H].set(params["b_ih"][H:2 * H].astype(f32))
    b2 = b2.at[0, 2 * SEG:2 * SEG + H].set(params["b_ih"][2 * H:3 * H].astype(f32))
    b2 = b2.at[0, 3 * SEG:3 * SEG + O].set(params["out_b"].astype(f32))

    Wc_a_T = comb_w[:, O:O + H].T            # (H, H), for the per-sequence enc_c fold
    return dict(W1=W1, W2=W2, b2=b2, Wc_a_T=Wc_a_T, H=H, O=O, L=L)


def prepare_encoder(packed, encoder_outputs):
    """Per-sequence fold+pad (hoisted): enc_c = enc @ Wc_a.T, zero-padded to 128 rows."""
    H, L = packed["H"], packed["L"]
    enc_c = encoder_outputs.astype(jnp.float32) @ packed["Wc_a_T"]     # (L, H)
    return jnp.zeros((SEG, H), jnp.float32).at[0:L, :].set(enc_c)


def _prepare_inputs(packed, inputs):
    """(T, O) decoder inputs -> (T,1,128): x at lanes [H,H+O), constant 1 at lane H+O."""
    H, O = packed["H"], packed["O"]
    T = inputs.shape[0]
    x = inputs.reshape(T, -1).astype(jnp.float32)
    xs = jnp.zeros((T, 1, SEG), jnp.float32)
    xs = xs.at[:, 0, H:H + O].set(x)
    xs = xs.at[:, 0, H + O].set(1.0)
    return xs


def _prepare_hidden(packed, hidden):
    H = packed["H"]
    h = hidden.reshape(1, -1).astype(jnp.float32)
    return jnp.zeros((1, SEG), jnp.float32).at[:, 0:H].set(h)


def attn_decoder_decode(packed, inputs, hidden0, encoder_outputs):
    """T teacher-forced decode steps in ONE pallas_call (weights stay VMEM-resident).

    inputs: (T, O) per-step decoder inputs.  Returns (out_seq (T,O),
    final hidden (1,1,H), attn_weights (T,L)) — step t matches AttnDecoderRNN.forward
    applied with the hidden produced by step t-1.
    """
    H, O, L = packed["H"], packed["O"], packed["L"]
    x_seq = _prepare_inputs(packed, inputs)
    h0_pad = _prepare_hidden(packed, hidden0)
    enc_c = prepare_encoder(packed, encoder_outputs)
    T = x_seq.shape[0]

    kernel = functools.partial(_attn_decoder_kernel, H=H, O=O)
    packed_out = pl.pallas_call(
        kernel,
        out_shape=jax.ShapeDtypeStruct((T, 1, SEG), jnp.float32),
        grid=(T,),
        in_specs=[
            pl.BlockSpec((None, 1, SEG), lambda t: (t, 0, 0)),      # per-step input
            pl.BlockSpec((1, SEG), lambda t: (0, 0)),               # h0 (loaded once)
            pl.BlockSpec((SEG, H), lambda t: (0, 0)),               # enc_c (resident)
            pl.BlockSpec((SEG, 5 * SEG), lambda t: (0, 0)),         # W1 (resident)
            pl.BlockSpec((H, 4 * SEG), lambda t: (0, 0)),           # W2 (resident)
            pl.BlockSpec((1, 4 * SEG), lambda t: (0, 0)),           # b2 (resident)
        ],
        out_specs=pl.BlockSpec((None, 1, SEG), lambda t: (t, 0, 0)),
        scratch_shapes=[pltpu.VMEM((1, SEG), jnp.float32)],          # carried hidden
        compiler_params=pltpu.CompilerParams(dimension_semantics=("arbitrary",)),
    )(x_seq, h0_pad, enc_c, packed["W1"], packed["W2"], packed["b2"])

    packed_out = packed_out.reshape(T, SEG)
    out_seq = packed_out[:, 0:O]
    h_final = packed_out[T - 1, O:O + H].reshape(1, 1, H)
    aw_seq = packed_out[:, O + H:O + H + L]
    return out_seq, h_final, aw_seq


def attn_decoder_forward(packed, inp, hidden, encoder_outputs):
    """Single step — mirrors AttnDecoderRNN.forward (dropout declared but unused there)."""
    out, h_new, aw = attn_decoder_decode(packed, jnp.reshape(inp, (1, -1)),
                                         hidden, encoder_outputs)
    return out, h_new, aw


# ----------------------------- pure-JAX references -----------------------------
def reference_forward(params, inp, hidden, encoder_outputs):
    H = params["H"]
    x = jnp.reshape(inp, (1, 1, -1))[0]
    h = hidden[0]
    cat1 = jnp.concatenate([x, h], axis=1)
    aw = jax.nn.softmax(cat1 @ params["attn_w"].T + params["attn_b"], axis=1)
    applied = aw @ encoder_outputs
    cat2 = jnp.concatenate([x, applied], axis=1)
    gx = jax.nn.relu(cat2 @ params["comb_w"].T + params["comb_b"])
    gi = gx @ params["w_ih"].T + params["b_ih"]
    gh = h @ params["w_hh"].T + params["b_hh"]
    i_r, i_z, i_n = gi[:, :H], gi[:, H:2 * H], gi[:, 2 * H:]
    h_r, h_z, h_n = gh[:, :H], gh[:, H:2 * H], gh[:, 2 * H:]
    r = jax.nn.sigmoid(i_r + h_r)
    z = jax.nn.sigmoid(i_z + h_z)
    n = jnp.tanh(i_n + r * h_n)
    h_new = (1.0 - z) * n + z * h
    out = jax.nn.softmax(h_new @ params["out_w"].T + params["out_b"], axis=1)
    return out, h_new.reshape(1, 1, H), aw


def reference_decode(params, inputs, hidden0, encoder_outputs):
    h = hidden0
    outs, aws = [], []
    for t in range(inputs.shape[0]):
        o, h, a = reference_forward(params, inputs[t], h, encoder_outputs)
        outs.append(o)
        aws.append(a)
    return jnp.concatenate(outs, 0), h, jnp.concatenate(aws, 0)


if __name__ == "__main__":
    H = 32          # hidden_size
    O = 32          # output_size (== flattened decoder input size)
    L = MAX_LENGTH  # max_length = 36
    T = 8           # decode steps fused into one kernel launch

    key = jax.random.PRNGKey(0)
    ks = jax.random.split(key, 16)

    def init(k, shape, scale=0.1):
        return (scale * jax.random.normal(k, shape)).astype(jnp.float32)

    params = dict(
        H=H, O=O, L=L,
        attn_w=init(ks[0], (L, H + O)), attn_b=init(ks[1], (L,)),
        comb_w=init(ks[2], (H, H + O)), comb_b=init(ks[3], (H,)),
        w_ih=init(ks[4], (3 * H, H)), w_hh=init(ks[5], (3 * H, H)),
        b_ih=init(ks[6], (3 * H,)), b_hh=init(ks[7], (3 * H,)),
        out_w=init(ks[8], (O, H)), out_b=init(ks[9], (O,)),
    )

    inputs = init(ks[10], (T, O), scale=1.0)              # per-step decoder inputs
    hidden0 = init(ks[11], (1, 1, H), scale=1.0)          # initial GRU hidden
    encoder_outputs = init(ks[12], (L, H), scale=1.0)     # (max_length, H)

    packed = pack_params(params)                          # one-time weight packing

    # --- single decode step (exactly AttnDecoderRNN.forward) -------------------
    out1, h1, aw1 = attn_decoder_forward(packed, inputs[0], hidden0, encoder_outputs)
    jax.block_until_ready((out1, h1, aw1))
    r_out1, r_h1, r_aw1 = reference_forward(params, inputs[0], hidden0, encoder_outputs)
    np.testing.assert_allclose(np.asarray(out1), np.asarray(r_out1), rtol=1e-4, atol=2e-5)
    np.testing.assert_allclose(np.asarray(h1), np.asarray(r_h1), rtol=1e-4, atol=2e-5)
    np.testing.assert_allclose(np.asarray(aw1), np.asarray(r_aw1), rtol=1e-4, atol=2e-5)

    # --- T-step loop-fused decode (hidden carried in VMEM scratch) -------------
    out_seq, h_fin, aw_seq = attn_decoder_decode(packed, inputs, hidden0, encoder_outputs)
    jax.block_until_ready((out_seq, h_fin, aw_seq))
    r_out, r_h, r_aw = reference_decode(params, inputs, hidden0, encoder_outputs)
    np.testing.assert_allclose(np.asarray(out_seq), np.asarray(r_out), rtol=1e-4, atol=3e-5)
    np.testing.assert_allclose(np.asarray(h_fin), np.asarray(r_h), rtol=1e-4, atol=3e-5)
    np.testing.assert_allclose(np.asarray(aw_seq), np.asarray(r_aw), rtol=1e-4, atol=3e-5)

    print("KERNEL_OK")
</pallas_src>

<mosaic_0001>
module attributes {stable_mosaic.version = 11 : i64} {
  func.func @_attn_decoder_kernel(%arg0: i32, %arg1: memref<1x1x128xf32, #tpu.memory_space<vmem>>, %arg2: memref<1x128xf32, #tpu.memory_space<vmem>>, %arg3: memref<128x32xf32, #tpu.memory_space<vmem>>, %arg4: memref<128x640xf32, #tpu.memory_space<vmem>>, %arg5: memref<32x512xf32, #tpu.memory_space<vmem>>, %arg6: memref<1x512xf32, #tpu.memory_space<vmem>>, %arg7: memref<1x1x128xf32, #tpu.memory_space<vmem>>, %arg8: memref<1x128xf32, #tpu.memory_space<vmem>>) attributes {dimension_semantics = [#tpu.dimension_semantics<arbitrary>], iteration_bounds = array<i64: 1>, scalar_prefetch = 0 : i64, scratch_operands = 1 : i64, tpu.core_type = #tpu.core_type<tc>, window_params = [{transform_indices = @transform_0, window_bounds = array<i64: 1, 1, 128>}, {pipeline_mode = #tpu.pipeline_mode<synchronous>, transform_indices = @transform_1, window_bounds = array<i64: 1, 128>}, {pipeline_mode = #tpu.pipeline_mode<synchronous>, transform_indices = @transform_2, window_bounds = array<i64: 128, 32>}, {pipeline_mode = #tpu.pipeline_mode<synchronous>, transform_indices = @transform_3, window_bounds = array<i64: 128, 640>}, {pipeline_mode = #tpu.pipeline_mode<synchronous>, transform_indices = @transform_4, window_bounds = array<i64: 32, 512>}, {pipeline_mode = #tpu.pipeline_mode<synchronous>, transform_indices = @transform_5, window_bounds = array<i64: 1, 512>}, {transform_indices = @transform_6, window_bounds = array<i64: 1, 1, 128>}]} {
    %c0_i32 = arith.constant 0 : i32
    %0 = arith.cmpi eq, %arg0, %c0_i32 : i32
    %1 = arith.extui %0 : i1 to i32
    %c0_i32_0 = arith.constant 0 : i32
    %2 = arith.cmpi ne, %1, %c0_i32_0 : i32
    scf.if %2 {
      %c0_40 = arith.constant 0 : index
      %c0_41 = arith.constant 0 : index
      %90 = vector.load %arg2[%c0_40, %c0_41] : memref<1x128xf32, #tpu.memory_space<vmem>>, vector<1x128xf32>
      %c0_42 = arith.constant 0 : index
      %c0_43 = arith.constant 0 : index
      %91 = vector.load %arg8[%c0_42, %c0_43] : memref<1x128xf32, #tpu.memory_space<vmem>>, vector<1x128xf32>
      tpu.vector_store %arg8[%c0_42, %c0_43], %90 {strides = array<i32>} : memref<1x128xf32, #tpu.memory_space<vmem>>, vector<1x128xf32>,
    } else {
    }
    %c0 = arith.constant 0 : index
    %c0_1 = arith.constant 0 : index
    %3 = vector.load %arg8[%c0, %c0_1] : memref<1x128xf32, #tpu.memory_space<vmem>>, vector<1x128xf32>
    %c0_2 = arith.constant 0 : index
    %c0_3 = arith.constant 0 : index
    %c0_4 = arith.constant 0 : index
    %4 = vector.load %arg1[%c0_2, %c0_3, %c0_4] : memref<1x1x128xf32, #tpu.memory_space<vmem>>, vector<1x1x128xf32>
    %5 = vector.shape_cast %4 : vector<1x1x128xf32> to vector<1x128xf32>
    %6 = arith.addf %3, %5 : vector<1x128xf32>
    %c0_5 = arith.constant 0 : index
    %c0_6 = arith.constant 0 : index
    %7 = vector.load %arg4[%c0_5, %c0_6] : memref<128x640xf32, #tpu.memory_space<vmem>>, vector<128x640xf32>
    %cst = arith.constant dense<0.000000e+00> : vector<1x640xf32>
    %8 = tpu.matmul %6, %7, %cst {dimension_numbers = #tpu.dot_dimension_numbers<[1], [0], [0], [1], [0, 0, 1, 1], [], []>} : vector<1x128xf32>, vector<128x640xf32>, vector<1x640xf32> -> vector<1x640xf32>
    %9 = vector.extract_strided_slice %8 {offsets = [0, 0], sizes = [1, 128], strides = [1, 1]} : vector<1x640xf32> to vector<1x128xf32>
    %cst_7 = arith.constant dense<0xFF800000> : vector<1xf32>
    %10 = vector.multi_reduction <maximumf>, %9, %cst_7 [1] : vector<1x128xf32> to vector<1xf32>
    %11 = vector.shape_cast %10 : vector<1xf32> to vector<1x1xf32>
    %12 = vector.broadcast %11 : vector<1x1xf32> to vector<1x128xf32>
    %13 = arith.subf %9, %12 : vector<1x128xf32>
    %14 = math.exp %13 : vector<1x128xf32>
    %cst_8 = arith.constant dense<0.000000e+00> : vector<1xf32>
    %15 = vector.multi_reduction <add>, %14, %cst_8 [1] : vector<1x128xf32> to vector<1xf32>
    %16 = vector.shape_cast %15 : vector<1xf32> to vector<1x1xf32>
    %17 = tpu.reciprocal %16 {approx = true} : vector<1x1xf32> -> vector<1x1xf32>
    %18 = arith.mulf %16, %17 : vector<1x1xf32>
    %cst_9 = arith.constant 2.000000e+00 : f32
    %19 = vector.broadcast %cst_9 : f32 to vector<1x1xf32>
    %20 = arith.subf %19, %18 : vector<1x1xf32>
    %21 = arith.mulf %17, %20 : vector<1x1xf32>
    %22 = vector.broadcast %21 : vector<1x1xf32> to vector<1x128xf32>
    %23 = arith.mulf %14, %22 : vector<1x128xf32>
    %c0_10 = arith.constant 0 : index
    %c0_11 = arith.constant 0 : index
    %24 = vector.load %arg3[%c0_10, %c0_11] : memref<128x32xf32, #tpu.memory_space<vmem>>, vector<128x32xf32>
    %cst_12 = arith.constant dense<0.000000e+00> : vector<1x32xf32>
    %25 = tpu.matmul %23, %24, %cst_12 {dimension_numbers = #tpu.dot_dimension_numbers<[1], [0], [0], [1], [0, 0, 1, 1], [], []>} : vector<1x128xf32>, vector<128x32xf32>, vector<1x32xf32> -> vector<1x32xf32>
    %26 = vector.extract_strided_slice %8 {offsets = [0, 128], sizes = [1, 32], strides = [1, 1]} : vector<1x640xf32> to vector<1x32xf32>
    %27 = arith.addf %26, %25 : vector<1x32xf32>
    %cst_13 = arith.constant 0.000000e+00 : f32
    %28 = vector.broadcast %cst_13 : f32 to vector<1x32xf32>
    %29 = arith.maximumf %27, %28 : vector<1x32xf32>
    %c0_14 = arith.constant 0 : index
    %c0_15 = arith.constant 0 : index
    %30 = vector.load %arg5[%c0_14, %c0_15] : memref<32x512xf32, #tpu.memory_space<vmem>>, vector<32x384xf32>
    %cst_16 = arith.constant dense<0.000000e+00> : vector<1x384xf32>
    %31 = tpu.matmul %29, %30, %cst_16 {dimension_numbers = #tpu.dot_dimension_numbers<[1], [0], [0], [1], [0, 0, 1, 1], [], []>} : vector<1x32xf32>, vector<32x384xf32>, vector<1x384xf32> -> vector<1x384xf32>
    %c0_17 = arith.constant 0 : index
    %c0_18 = arith.constant 0 : index
    %32 = vector.load %arg6[%c0_17, %c0_18] : memref<1x512xf32, #tpu.memory_space<vmem>>, vector<1x384xf32>
    %33 = arith.addf %31, %32 : vector<1x384xf32>
    %c0_19 = arith.constant 0 : index
    %c0_20 = arith.constant 0 : index
    %34 = vector.load %arg8[%c0_19, %c0_20] : memref<1x128xf32, #tpu.memory_space<vmem>>, vector<1x32xf32>
    %35 = vector.extract_strided_slice %33 {offsets = [0, 0], sizes = [1, 32], strides = [1, 1]} : vector<1x384xf32> to vector<1x32xf32>
    %36 = vector.extract_strided_slice %8 {offsets = [0, 256], sizes = [1, 32], strides = [1, 1]} : vector<1x640xf32> to vector<1x32xf32>
    %37 = arith.addf %35, %36 : vector<1x32xf32>
    %38 = arith.negf %37 : vector<1x32xf32>
    %39 = math.exp %38 : vector<1x32xf32>
    %cst_21 = arith.constant 1.000000e+00 : f32
    %40 = vector.broadcast %cst_21 : f32 to vector<1x32xf32>
    %41 = arith.addf %40, %39 : vector<1x32xf32>
    %42 = arith.divf %40, %41 : vector<1x32xf32>
    %43 = vector.extract_strided_slice %33 {offsets = [0, 128], sizes = [1, 32], strides = [1, 1]} : vector<1x384xf32> to vector<1x32xf32>
    %44 = vector.extract_strided_slice %8 {offsets = [0, 384], sizes = [1, 32], strides = [1, 1]} : vector<1x640xf32> to vector<1x32xf32>
    %45 = arith.addf %43, %44 : vector<1x32xf32>
    %46 = arith.negf %45 : vector<1x32xf32>
    %47 = math.exp %46 : vector<1x32xf32>
    %cst_22 = arith.constant 1.000000e+00 : f32
    %48 = vector.broadcast %cst_22 : f32 to vector<1x32xf32>
    %49 = arith.addf %48, %47 : vector<1x32xf32>
    %50 = arith.divf %48, %49 : vector<1x32xf32>
    %51 = vector.extract_strided_slice %33 {offsets = [0, 256], sizes = [1, 32], strides = [1, 1]} : vector<1x384xf32> to vector<1x32xf32>
    %52 = vector.extract_strided_slice %8 {offsets = [0, 512], sizes = [1, 32], strides = [1, 1]} : vector<1x640xf32> to vector<1x32xf32>
    %53 = arith.mulf %42, %52 : vector<1x32xf32>
    %54 = arith.addf %51, %53 : vector<1x32xf32>
    %55 = math.tanh %54 : vector<1x32xf32>
    %cst_23 = arith.constant 1.000000e+00 : f32
    %56 = vector.broadcast %cst_23 : f32 to vector<1x32xf32>
    %57 = arith.subf %56, %50 : vector<1x32xf32>
    %58 = arith.mulf %57, %55 : vector<1x32xf32>
    %59 = arith.mulf %50, %34 : vector<1x32xf32>
    %60 = arith.addf %58, %59 : vector<1x32xf32>
    %c0_24 = arith.constant 0 : index
    %c384 = arith.constant 384 : index
    %61 = vector.load %arg5[%c0_24, %c384] : memref<32x512xf32, #tpu.memory_space<vmem>>, vector<32x32xf32>
    %cst_25 = arith.constant dense<0.000000e+00> : vector<1x32xf32>
    %62 = tpu.matmul %60, %61, %cst_25 {dimension_numbers = #tpu.dot_dimension_numbers<[1], [0], [0], [1], [0, 0, 1, 1], [], []>} : vector<1x32xf32>, vector<32x32xf32>, vector<1x32xf32> -> vector<1x32xf32>
    %c0_26 = arith.constant 0 : index
    %c384_27 = arith.constant 384 : index
    %63 = vector.load %arg6[%c0_26, %c384_27] : memref<1x512xf32, #tpu.memory_space<vmem>>, vector<1x32xf32>
    %64 = arith.addf %62, %63 : vector<1x32xf32>
    %cst_28 = arith.constant dense<0xFF800000> : vector<1xf32>
    %65 = vector.multi_reduction <maximumf>, %64, %cst_28 [1] : vector<1x32xf32> to vector<1xf32>
    %66 = vector.shape_cast %65 : vector<1xf32> to vector<1x1xf32>
    %67 = vector.broadcast %66 : vector<1x1xf32> to vector<1x32xf32>
    %68 = arith.subf %64, %67 : vector<1x32xf32>
    %69 = math.exp %68 : vector<1x32xf32>
    %cst_29 = arith.constant dense<0.000000e+00> : vector<1xf32>
    %70 = vector.multi_reduction <add>, %69, %cst_29 [1] : vector<1x32xf32> to vector<1xf32>
    %71 = vector.shape_cast %70 : vector<1xf32> to vector<1x1xf32>
    %72 = tpu.reciprocal %71 {approx = true} : vector<1x1xf32> -> vector<1x1xf32>
    %73 = arith.mulf %71, %72 : vector<1x1xf32>
    %cst_30 = arith.constant 2.000000e+00 : f32
    %74 = vector.broadcast %cst_30 : f32 to vector<1x1xf32>
    %75 = arith.subf %74, %73 : vector<1x1xf32>
    %76 = arith.mulf %72, %75 : vector<1x1xf32>
    %77 = vector.broadcast %76 : vector<1x1xf32> to vector<1x32xf32>
    %78 = arith.mulf %69, %77 : vector<1x32xf32>
    %c0_31 = arith.constant 0 : index
    %c0_32 = arith.constant 0 : index
    %c0_33 = arith.constant 0 : index
    %79 = vector.load %arg7[%c0_31, %c0_32, %c0_33] : memref<1x1x128xf32, #tpu.memory_space<vmem>>, vector<1x1x32xf32>
    %80 = vector.shape_cast %79 : vector<1x1x32xf32> to vector<1x32xf32>
    %81 = vector.shape_cast %78 : vector<1x32xf32> to vector<1x1x32xf32>
    tpu.vector_store %arg7[%c0_31, %c0_32, %c0_33], %81 {strides = array<i32>} : memref<1x1x128xf32, #tpu.memory_space<vmem>>, vector<1x1x32xf32>,
    %c0_34 = arith.constant 0 : index
    %c0_35 = arith.constant 0 : index
    %c32 = arith.constant 32 : index
    %82 = vector.load %arg7[%c0_34, %c0_35, %c32] : memref<1x1x128xf32, #tpu.memory_space<vmem>>, vector<1x1x32xf32>
    %83 = vector.shape_cast %82 : vector<1x1x32xf32> to vector<1x32xf32>
    %84 = vector.shape_cast %60 : vector<1x32xf32> to vector<1x1x32xf32>
    tpu.vector_store %arg7[%c0_34, %c0_35, %c32], %84 {strides = array<i32>} : memref<1x1x128xf32, #tpu.memory_space<vmem>>, vector<1x1x32xf32>,
    %85 = vector.extract_strided_slice %23 {offsets = [0, 0], sizes = [1, 64], strides = [1, 1]} : vector<1x128xf32> to vector<1x64xf32>
    %c0_36 = arith.constant 0 : index
    %c0_37 = arith.constant 0 : index
    %c64 = arith.constant 64 : index
    %86 = vector.load %arg7[%c0_36, %c0_37, %c64] : memref<1x1x128xf32, #tpu.memory_space<vmem>>, vector<1x1x64xf32>
    %87 = vector.shape_cast %86 : vector<1x1x64xf32> to vector<1x64xf32>
    %88 = vector.shape_cast %85 : vector<1x64xf32> to vector<1x1x64xf32>
    tpu.vector_store %arg7[%c0_36, %c0_37, %c64], %88 {strides = array<i32>} : memref<1x1x128xf32, #tpu.memory_space<vmem>>, vector<1x1x64xf32>,
    %c0_38 = arith.constant 0 : index
    %c0_39 = arith.constant 0 : index
    %89 = vector.load %arg8[%c0_38, %c0_39] : memref<1x128xf32, #tpu.memory_space<vmem>>, vector<1x32xf32>
    tpu.vector_store %arg8[%c0_38, %c0_39], %60 {strides = array<i32>} : memref<1x128xf32, #tpu.memory_space<vmem>>, vector<1x32xf32>,
    return
  }
  func.func @transform_0(%arg0: i32) -> (i32, i32, i32) {
    %c0_i32 = arith.constant 0 : i32
    %c0_i32_0 = arith.constant 0 : i32
    %c0_i32_1 = arith.constant 0 : i32
    return %arg0, %c0_i32, %c0_i32_0 : i32, i32, i32
  }
  func.func @transform_1(%arg0: i32) -> (i32, i32) {
    %c0_i32 = arith.constant 0 : i32
    %c0_i32_0 = arith.constant 0 : i32
    %c0_i32_1 = arith.constant 0 : i32
    return %c0_i32, %c0_i32_0 : i32, i32
  }
  func.func @transform_2(%arg0: i32) -> (i32, i32) {
    %c0_i32 = arith.constant 0 : i32
    %c0_i32_0 = arith.constant 0 : i32
    %c0_i32_1 = arith.constant 0 : i32
    return %c0_i32, %c0_i32_0 : i32, i32
  }
  func.func @transform_3(%arg0: i32) -> (i32, i32) {
    %c0_i32 = arith.constant 0 : i32
    %c0_i32_0 = arith.constant 0 : i32
    %c0_i32_1 = arith.constant 0 : i32
    return %c0_i32, %c0_i32_0 : i32, i32
  }
  func.func @transform_4(%arg0: i32) -> (i32, i32) {
    %c0_i32 = arith.constant 0 : i32
    %c0_i32_0 = arith.constant 0 : i32
    %c0_i32_1 = arith.constant 0 : i32
    return %c0_i32, %c0_i32_0 : i32, i32
  }
  func.func @transform_5(%arg0: i32) -> (i32, i32) {
    %c0_i32 = arith.constant 0 : i32
    %c0_i32_0 = arith.constant 0 : i32
    %c0_i32_1 = arith.constant 0 : i32
    return %c0_i32, %c0_i32_0 : i32, i32
  }
  func.func @transform_6(%arg0: i32) -> (i32, i32, i32) {
    %c0_i32 = arith.constant 0 : i32
    %c0_i32_0 = arith.constant 0 : i32
    %c0_i32_1 = arith.constant 0 : i32
    return %arg0, %c0_i32, %c0_i32_0 : i32, i32, i32
  }
}

</mosaic_0001>

<bundles_post_ra>
// kernel: tpu_custom_call.1
= control target key start
LH: loop header
LB: loop body
LE: loop exit
PB: predicated region body
PF: predicated region fallthrough
CT: control target
= control target key end

     0   :  { %11 = vsyncpa [#allocation4], 0  ;;  %s1207_s0 = inlined_call_operand.vmem [shape: f32[1,1,128], index: 0, kind: input, shape index: {}]   ;;  %s1208_s1 = inlined_call_operand.vmem [shape: f32[1,128], index: 1, kind: input, shape index: {}]   ;;  %s1209_s2 = inlined_call_operand.vmem [shape: f32[128,32], index: 2, kind: input, shape index: {}]   ;;  %s1210_s3 = inlined_call_operand.hbm [shape: f32[128,640], index: 3, kind: input, shape index: {}]   ;;  %s1211_s4 = inlined_call_operand.vmem [shape: f32[32,512], index: 4, kind: input, shape index: {}]   ;;  %s1212_s5 = inlined_call_operand.vmem [shape: f32[1,512], index: 5, kind: input, shape index: {}]   ;;  %s1213_s6 = inlined_call_operand.hbm [shape: f32[1,1,128], index: 6, kind: output, shape index: {}]  }
   0x1   :  { %12 = vsyncpa [#allocation5], 0  ;;  %s969_s21 = smov [#allocation3]  }
   0x2   :  { %s24_s22 = sshll.u32 %s969_s21, 4  ;;  %s25_s22 = int_to_ptr.vmem [resolvable:$true] %s24_s22 }
   0x3   :  { %s933_s23 = scalar_lea.vmem %s25_s22, 10240  ;;  %p938_p1 = scmp.lt.s32.totalorder %s25_s22, %s25_s22 }
   0x4   :  { %p934_p0 = scmp.ne.s32.totalorder %s25_s22, %s933_s23  ;;  %p939_p2 = scmp.lt.s32.totalorder %s933_s23, %s933_s23 }
   0x6   :  { %p940_p3 = por %p939_p2, %p938_p1 }
   0x8   :  { %p941_p4 = pnand %p940_p3, %p934_p0 }
   0xa   :  { %944 = shalt.err (!%p941_p4)
}
   0xb   :  { %s970_s24 = smov 640   ;;  %s971_s25 = smov 40  }
   0xc   :  { %30 = dma.hbm_to_vmem [thread:$0]  %s1210_s3, 10240, %s25_s22, [#allocation4], %s970_s24, %s970_s24, %s971_s25  }
   0xd   :  { %965 = dma.done.wait [#allocation4], 10240  }
   0xe   :  { %966 = vsyncadd [#allocation4], 4294957056  ;;  %v972_v0 = vmov 0.0   ;;  %v123_v1 = vld [vmem:[#allocation3 + $0x260] sm:$0xff]  ;;  %v122_v2 = vld [vmem:[#allocation3 + $0x258] sm:$0xff]  ;;  %vm339_vm0 = vcmask 1040384  }
   0xf   :  { %191 = vmatprep.mubr.f32.mxu0 %v972_v0  ;;  %262 = vmatprep.mubr.f32.mxu1 %v972_v0  ;;  %v118_v3 = vld [vmem:[#allocation3 + $0x238] sm:$0xff]  ;;  %v117_v4 = vld [vmem:[#allocation3 + $0x230] sm:$0xff]  ;;  %v112_v6 = vld [vmem:[#allocation3 + $0x208] sm:$0xff]  ;;  %vm973_vm1 = vmmov 0   ;;  %vm471_vm2 = vcmask 261120   ;;  %vm715_vm3 = vcmask 253952  }
  0x10   :  { %127 = vmatprep.subr.mxu0 %v123_v1  ;;  %v113_v5 = vld [vmem:[#allocation3 + $0x210] sm:$0xff]  ;;  %v108_v7 = vld [vmem:[#allocation3 + $0x1e8] sm:$0xff]  ;;  %v107_v8 = vld [vmem:[#allocation3 + $0x1e0] sm:$0xff]  ;;  %s975_s17 = smov 64   ;;  %vm734_vm4 = vcmask 516352   ;;  %vm740_vm5 = vcmask 1040896  }
  0x11   :  { %128 = vmatpush1.msra.mxu0 %v122_v2  ;;  %v103_v9 = vld [vmem:[#allocation3 + $0x1c0] sm:$0xff]  ;;  %v102_v10 = vld [vmem:[#allocation3 + $0x1b8] sm:$0xff]  ;;  %v97_v12 = vld [vmem:[#allocation3 + $0x190] sm:$0xff] }
  0x12   :  { %129 = vmatprep.subr.mxu0 %v118_v3  ;;  %v98_v11 = vld [vmem:[#allocation3 + $0x198] sm:$0xff]  ;;  %v93_v13 = vld [vmem:[#allocation3 + $0x170] sm:$0xff]  ;;  %v92_v15 = vld [vmem:[#allocation3 + $0x168] sm:$0xff] }
  0x13   :  { %130 = vmatpush1.msra.mxu0 %v117_v4  ;;  %v42_v14 = vld [vmem:[%s1208_s1] sm:$0x1]  ;;  %v88_v16 = vld [vmem:[#allocation3 + $0x148] sm:$0xff]  ;;  %v87_v17 = vld [vmem:[#allocation3 + $0x140] sm:$0xff] }
  0x14   :  { %131 = vmatprep.subr.mxu0 %v113_v5  ;;  %43 = vst [vmem:[#allocation2] sm:$0x1] %v42_v14  ;;  %v83_v18 = vld [vmem:[#allocation3 + $0x120] sm:$0xff]  ;;  %v82_v19 = vld [vmem:[#allocation3 + $0x118] sm:$0xff]  ;;  %v77_v21 = vld [vmem:[#allocation3 + $0xf0] sm:$0xff] }
  0x15   :  { %132 = vmatpush1.msra.mxu0 %v112_v6  ;;  %v78_v20 = vld [vmem:[#allocation3 + $0xf8] sm:$0xff]  ;;  %v73_v22 = vld [vmem:[#allocation3 + $0xd0] sm:$0xff]  ;;  %v72_v23 = vld [vmem:[#allocation3 + $0xc8] sm:$0xff] }
  0x16   :  { %133 = vmatprep.subr.mxu0 %v108_v7  ;;  %v68_v24 = vld [vmem:[#allocation3 + $0xa8] sm:$0xff]  ;;  %v67_v25 = vld [vmem:[#allocation3 + $0xa0] sm:$0xff]  ;;  %v62_v27 = vld [vmem:[#allocation3 + $0x78] sm:$0xff] }
  0x17   :  { %134 = vmatpush1.msra.mxu0 %v107_v8  ;;  %v63_v26 = vld [vmem:[#allocation3 + $0x80] sm:$0xff]  ;;  %v58_v28 = vld [vmem:[#allocation3 + $0x58] sm:$0xff]  ;;  %v57_v29 = vld [vmem:[#allocation3 + $0x50] sm:$0xff] }
  0x18   :  { %135 = vmatprep.subr.mxu0 %v103_v9  ;;  %v53_v30 = vld [vmem:[#allocation3 + $0x30] sm:$0xff]  ;;  %v45_v32 = vld [vmem:[%s1207_s0] sm:$0x1]  ;;  %v52_v33 = vld [vmem:[#allocation3 + $0x28] sm:$0xff] }
  0x19   :  { %136 = vmatpush1.msra.mxu0 %v102_v10  ;;  %v48_v34 = vld [vmem:[#allocation3 + $0x8] sm:$0xff]  ;;  %v47_v35 = vld [vmem:[#allocation3] sm:$0xff]  ;;  %v125_v39 = vld [vmem:[#allocation3 + $0x270] sm:$0xff] }
  0x1a   :  { %137 = vmatprep.subr.mxu0 %v98_v11  ;;  %v124_v40 = vld [vmem:[#allocation3 + $0x268] sm:$0xff]  ;;  %198 = vmatprep.subr.mxu1 %v125_v39  ;;  %v119_v42 = vld [vmem:[#allocation3 + $0x240] sm:$0xff]  ;;  %v114_v44 = vld [vmem:[#allocation3 + $0x218] sm:$0xff] }
  0x1b   :  { %138 = vmatpush1.msra.mxu0 %v97_v12  ;;  %v1020_v31 = vld [vmem:[#allocation2] sm:$0x1]  ;;  %v120_v41 = vld [vmem:[#allocation3 + $0x248] sm:$0xff]  ;;  %199 = vmatpush1.msra.mxu1 %v124_v40  ;;  %v115_v43 = vld [vmem:[#allocation3 + $0x220] sm:$0xff] }
  0x1c   :  { %139 = vmatprep.subr.mxu0 %v93_v13  ;;  %v1026_v36 = vadd.f32 %v45_v32, %v1020_v31  ;;  %200 = vmatprep.subr.mxu1 %v120_v41  ;;  %v110_v45 = vld [vmem:[#allocation3 + $0x1f8] sm:$0xff]  ;;  %v109_v46 = vld [vmem:[#allocation3 + $0x1f0] sm:$0xff]  ;;  %v104_v48 = vld [vmem:[#allocation3 + $0x1c8] sm:$0xff] }
  0x1d   :  { %140 = vmatpush1.msra.mxu0 %v92_v15  ;;  %201 = vmatpush1.msra.mxu1 %v119_v42  ;;  %v105_v47 = vld [vmem:[#allocation3 + $0x1d0] sm:$0xff]  ;;  %v100_v49 = vld [vmem:[#allocation3 + $0x1a8] sm:$0xff]  ;;  %v99_v50 = vld [vmem:[#allocation3 + $0x1a0] sm:$0xff] }
  0x1e   :  { %141 = vmatprep.subr.mxu0 %v88_v16  ;;  %202 = vmatprep.subr.mxu1 %v115_v43  ;;  %v95_v51 = vld [vmem:[#allocation3 + $0x180] sm:$0xff]  ;;  %v94_v52 = vld [vmem:[#allocation3 + $0x178] sm:$0xff]  ;;  %v89_v54 = vld [vmem:[#allocation3 + $0x150] sm:$0xff] }
  0x1f   :  { %142 = vmatpush1.msra.mxu0 %v87_v17  ;;  %203 = vmatpush1.msra.mxu1 %v114_v44  ;;  %v90_v53 = vld [vmem:[#allocation3 + $0x158] sm:$0xff]  ;;  %v85_v55 = vld [vmem:[#allocation3 + $0x130] sm:$0xff]  ;;  %v84_v56 = vld [vmem:[#allocation3 + $0x128] sm:$0xff] }
  0x20   :  { %143 = vmatprep.subr.mxu0 %v83_v18  ;;  %204 = vmatprep.subr.mxu1 %v110_v45  ;;  %v80_v57 = vld [vmem:[#allocation3 + $0x108] sm:$0xff]  ;;  %v79_v58 = vld [vmem:[#allocation3 + $0x100] sm:$0xff]  ;;  %v74_v60 = vld [vmem:[#allocation3 + $0xd8] sm:$0xff] }
  0x21   :  { %144 = vmatpush1.msra.mxu0 %v82_v19  ;;  %205 = vmatpush1.msra.mxu1 %v109_v46  ;;  %v75_v59 = vld [vmem:[#allocation3 + $0xe0] sm:$0xff]  ;;  %v70_v61 = vld [vmem:[#allocation3 + $0xb8] sm:$0xff]  ;;  %v69_v62 = vld [vmem:[#allocation3 + $0xb0] sm:$0xff] }
  0x22   :  { %145 = vmatprep.subr.mxu0 %v78_v20  ;;  %206 = vmatprep.subr.mxu1 %v105_v47  ;;  %v65_v63 = vld [vmem:[#allocation3 + $0x90] sm:$0xff]  ;;  %v64_v1 = vld [vmem:[#allocation3 + $0x88] sm:$0xff]  ;;  %v59_v3 = vld [vmem:[#allocation3 + $0x60] sm:$0xff] }
  0x23   :  { %146 = vmatpush1.msra.mxu0 %v77_v21  ;;  %207 = vmatpush1.msra.mxu1 %v104_v48  ;;  %v60_v2 = vld [vmem:[#allocation3 + $0x68] sm:$0xff]  ;;  %v55_v4 = vld [vmem:[#allocation3 + $0x40] sm:$0xff]  ;;  %v54_v5 = vld [vmem:[#allocation3 + $0x38] sm:$0xff] }
  0x24   :  { %147 = vmatprep.subr.mxu0 %v73_v22  ;;  %208 = vmatprep.subr.mxu1 %v100_v49  ;;  %v50_v6 = vld [vmem:[#allocation3 + $0x18] sm:$0xff]  ;;  %v49_v7 = vld [vmem:[#allocation3 + $0x10] sm:$0xff]  ;;  %v367_v10 = vld [vmem:[%s1209_s2 + $0x68] sm:$0xff] }
  0x25   :  { %148 = vmatpush1.msra.mxu0 %v72_v23  ;;  %209 = vmatpush1.msra.mxu1 %v99_v50  ;;  %v369_v8 = vld [vmem:[%s1209_s2 + $0x78] sm:$0xff]  ;;  %v368_v9 = vld [vmem:[%s1209_s2 + $0x70] sm:$0xff]  ;;  %v366_v11 = vld [vmem:[%s1209_s2 + $0x60] sm:$0xff] }
  0x26   :  { %149 = vmatprep.subr.mxu0 %v68_v24  ;;  %210 = vmatprep.subr.mxu1 %v95_v51  ;;  %v365_v12 = vld [vmem:[%s1209_s2 + $0x58] sm:$0xff]  ;;  %v364_v18 = vld [vmem:[%s1209_s2 + $0x50] sm:$0xff]  ;;  %v363_v19 = vld [vmem:[%s1209_s2 + $0x48] sm:$0xff] }
  0x27   :  { %150 = vmatpush1.msra.mxu0 %v67_v25  ;;  %211 = vmatpush1.msra.mxu1 %v94_v52  ;;  %v362_v20 = vld [vmem:[%s1209_s2 + $0x40] sm:$0xff]  ;;  %v361_v21 = vld [vmem:[%s1209_s2 + $0x38] sm:$0xff]  ;;  %v360_v22 = vld [vmem:[%s1209_s2 + $0x30] sm:$0xff] }
  0x28   :  { %151 = vmatprep.subr.mxu0 %v63_v26  ;;  %212 = vmatprep.subr.mxu1 %v90_v53  ;;  %v359_v23 = vld [vmem:[%s1209_s2 + $0x28] sm:$0xff]  ;;  %v358_v24 = vld [vmem:[%s1209_s2 + $0x20] sm:$0xff]  ;;  %v357_v25 = vld [vmem:[%s1209_s2 + $0x18] sm:$0xff] }
  0x29   :  { %152 = vmatpush1.msra.mxu0 %v62_v27  ;;  %213 = vmatpush1.msra.mxu1 %v89_v54  ;;  %v356_v26 = vld [vmem:[%s1209_s2 + $0x10] sm:$0xff]  ;;  %v355_v27 = vld [vmem:[%s1209_s2 + $0x8] sm:$0xff]  ;;  %v86_v39 = vld [vmem:[#allocation3 + $0x138] sm:$0xff] }
  0x2a   :  { %153 = vmatprep.subr.mxu0 %v58_v28  ;;  %214 = vmatprep.subr.mxu1 %v85_v55  ;;  %v354_v28 = vld [vmem:[%s1209_s2] sm:$0xff]  ;;  %v116_v32 = vld [vmem:[#allocation3 + $0x228] sm:$0xff]  ;;  %v81_v40 = vld [vmem:[#allocation3 + $0x110] sm:$0xff] }
  0x2b   :  { %154 = vmatpush1.msra.mxu0 %v57_v29  ;;  %215 = vmatpush1.msra.mxu1 %v84_v56  ;;  %v126_v29 = vld [vmem:[#allocation3 + $0x278] sm:$0xff]  ;;  %v76_v41 = vld [vmem:[#allocation3 + $0xe8] sm:$0xff]  ;;  %v71_v42 = vld [vmem:[#allocation3 + $0xc0] sm:$0xff] }
  0x2c   :  { %155 = vmatprep.subr.mxu0 %v53_v30  ;;  %216 = vmatprep.subr.mxu1 %v80_v57  ;;  %v121_v30 = vld [vmem:[#allocation3 + $0x250] sm:$0xff]  ;;  %v66_v43 = vld [vmem:[#allocation3 + $0x98] sm:$0xff]  ;;  %v56_v45 = vld [vmem:[#allocation3 + $0x48] sm:$0xff] }
  0x2d   :  { %156 = vmatpush1.msra.mxu0 %v52_v33  ;;  %217 = vmatpush1.msra.mxu1 %v79_v58  ;;  %v111_v33 = vld [vmem:[#allocation3 + $0x200] sm:$0xff]  ;;  %v61_v44 = vld [vmem:[#allocation3 + $0x70] sm:$0xff] }
  0x2e   :  { %157 = vmatprep.subr.mxu0 %v48_v34  ;;  %218 = vmatprep.subr.mxu1 %v75_v59  ;;  %v106_v34 = vld [vmem:[#allocation3 + $0x1d8] sm:$0xff]  ;;  %v51_v46 = vld [vmem:[#allocation3 + $0x20] sm:$0xff]  ;;  %v453_v56 = vld [vmem:[%s1211_s4 + $0x70] sm:$0xff] }
  0x2f   :  { %158 = vmatpush1.msra.mxu0 %v47_v35  ;;  %219 = vmatpush1.msra.mxu1 %v74_v60  ;;  %v101_v35 = vld [vmem:[#allocation3 + $0x1b0] sm:$0xff]  ;;  %v452_v47 = vld [vmem:[%s1211_s4 + $0x68] sm:$0xff]  ;;  %v451_v48 = vld [vmem:[%s1211_s4 + $0x60] sm:$0xff] }
  0x30   :  { %192 = vmatmul.mubr.f32.vlgmr.msra.gmra.mxu0 %v1026_v36  ;;  %807 = vmatprep.subr.mxu0 %v972_v0  ;;  %v449_v49 = vld [vmem:[%s1211_s4 + $0x48] sm:$0xff]  ;;  %v450_v57 = vld [vmem:[%s1211_s4 + $0x50] sm:$0xff]  ;;  %v445_v59 = vld [vmem:[%s1211_s4 + $0x20] sm:$0xff] }
  0x31   :  { %220 = vmatprep.subr.mxu1 %v70_v61  ;;  %839 = vmatprep.mubr.msk.f32.mxu0 %vm973_vm1, %v972_v0  ;;  %v446_v58 = vld [vmem:[%s1211_s4 + $0x28] sm:$0xff]  ;;  %v447_v60 = vld [vmem:[%s1211_s4 + $0x30] sm:$0xff] }
  0x32   :  { %221 = vmatpush1.msra.mxu1 %v69_v62  ;;  %808 = vmatpush3.msra.mxu0 %v126_v29  ;;  %v443_v61 = vld [vmem:[%s1211_s4 + $0x8] sm:$0xff]  ;;  %v442_v62 = vld [vmem:[%s1211_s4] sm:$0xff] }
  0x33   :  { %222 = vmatprep.subr.mxu1 %v65_v63  ;;  %809 = vmatprep.subr.mxu0 %v972_v0  ;;  %v444_v63 = vld [vmem:[%s1211_s4 + $0x10] sm:$0xff] }
  0x34   :  { %223 = vmatpush1.msra.mxu1 %v64_v1  ;;  %810 = vmatpush3.msra.mxu0 %v121_v30 }
  0x35   :  { %224 = vmatprep.subr.mxu1 %v60_v2  ;;  %811 = vmatprep.subr.mxu0 %v972_v0 }
  0x36   :  { %225 = vmatpush1.msra.mxu1 %v59_v3  ;;  %812 = vmatpush3.msra.mxu0 %v116_v32 }
  0x37   :  { %226 = vmatprep.subr.mxu1 %v55_v4  ;;  %813 = vmatprep.subr.mxu0 %v972_v0 }
  0x38   :  { %227 = vmatpush1.msra.mxu1 %v54_v5  ;;  %814 = vmatpush3.msra.mxu0 %v111_v33 }
  0x39   :  { %228 = vmatprep.subr.mxu1 %v50_v6  ;;  %815 = vmatprep.subr.mxu0 %v972_v0 }
  0x3a   :  { %229 = vmatpush1.msra.mxu1 %v49_v7  ;;  %816 = vmatpush3.msra.mxu0 %v106_v34 }
  0x3b   :  { %263 = vmatmul.mubr.f32.vlgmr.msra.gmra.mxu1 %v1026_v36  ;;  %842 = vmatprep.subr.mxu1 %v972_v0 }
  0x3c   :  { %843 = vmatpush3.msra.mxu1 %v369_v8  ;;  %874 = vmatprep.mubr.msk.f32.mxu1 %vm973_vm1, %v972_v0 }
  0x3d   :  { %844 = vmatprep.subr.mxu1 %v972_v0  ;;  %817 = vmatprep.subr.mxu0 %v972_v0 }
  0x3e   :  { %845 = vmatpush3.msra.mxu1 %v368_v9  ;;  %818 = vmatpush3.msra.mxu0 %v101_v35 }
  0x3f   :  { %846 = vmatprep.subr.mxu1 %v972_v0  ;;  %819 = vmatprep.subr.mxu0 %v972_v0 }
  0x40   :  { %847 = vmatpush3.msra.mxu1 %v367_v10  ;;  %v640_v10 = vld [vmem:[%s1211_s4 + $0x78] sm:$0xff] }
  0x41   :  { %848 = vmatprep.subr.mxu1 %v972_v0 }
  0x42   :  { %849 = vmatpush3.msra.mxu1 %v366_v11  ;;  %v639_v11 = vld [vmem:[%s1211_s4 + $0x58] sm:$0xff] }
  0x43   :  { %850 = vmatprep.subr.mxu1 %v972_v0 }
  0x44   :  { %851 = vmatpush3.msra.mxu1 %v365_v12  ;;  %v638_v12 = vld [vmem:[%s1211_s4 + $0x38] sm:$0xff] }
  0x45   :  { %852 = vmatprep.subr.mxu1 %v972_v0 }
  0x46   :  { %853 = vmatpush3.msra.mxu1 %v364_v18 }
  0x47   :  { %854 = vmatprep.subr.mxu1 %v972_v0 }
  0x48   :  { %855 = vmatpush3.msra.mxu1 %v363_v19 }
  0x49   :  { %856 = vmatprep.subr.mxu1 %v972_v0 }
  0x4a   :  { %857 = vmatpush3.msra.mxu1 %v362_v20 }
  0x4b   :  { %858 = vmatprep.subr.mxu1 %v972_v0 }
  0x4c   :  { %859 = vmatpush3.msra.mxu1 %v361_v21 }
  0x4d   :  { %860 = vmatprep.subr.mxu1 %v972_v0 }
  0x4e   :  { %861 = vmatpush3.msra.mxu1 %v360_v22 }
  0x4f   :  { %862 = vmatprep.subr.mxu1 %v972_v0 }
  0x50   :  { %863 = vmatpush3.msra.mxu1 %v359_v23 }
  0x51   :  { %864 = vmatprep.subr.mxu1 %v972_v0 }
  0x52   :  { %865 = vmatpush3.msra.mxu1 %v358_v24 }
  0x53   :  { %866 = vmatprep.subr.mxu1 %v972_v0 }
  0x54   :  { %867 = vmatpush3.msra.mxu1 %v357_v25 }
  0x55   :  { %868 = vmatprep.subr.mxu1 %v972_v0 }
  0x56   :  { %869 = vmatpush3.msra.mxu1 %v356_v26 }
  0x57   :  { %870 = vmatprep.subr.mxu1 %v972_v0 }
  0x58   :  { %871 = vmatpush3.msra.mxu1 %v355_v27 }
  0x59   :  { %872 = vmatprep.subr.mxu1 %v972_v0 }
  0x5a   :  { %873 = vmatpush3.msra.mxu1 %v354_v28 }
  0x5b   :  { %877 = vmatprep.subr.mxu1 %v972_v0 }
  0xf0   :  { %v1030_v37 = vpop.f32.mrf.mxu0 }
  0xf1   :  { %v340_v38 = vsel %vm339_vm0, %v1030_v37, -inf }
  0xf2   :  { %341 = vmax.xlane.f32.xlu0 %v340_v38  ;;  %v91_v38 = vld [vmem:[#allocation3 + $0x160] sm:$0xff]  ;;  %v195_v1 = vpop.f32.mrf.mxu0 }
  0xfb   :  { %v264_v4 = vpop.f32.mrf.mxu1 }
  0xfd   :  { %v266_v5 = vpop.f32.mrf.mxu1 }
 0x17b   :  { %v342_v13 = vpop.xlane.xlu0 %341 }
 0x17c   :  { %v343_v14 = vsub.f32 %v1030_v37, %v342_v13  ;;  %v96_v37 = vld [vmem:[#allocation3 + $0x188] sm:$0xff]  ;;  %v637_v13 = vld [vmem:[%s1211_s4 + $0x18] sm:$0xff] }
 0x17d   :  { %820 = vmatpush3.msra.mxu0 %v96_v37 }
 0x17e   :  { %v344_v15 = vmul.f32 1.442695, %v343_v14  ;;  %821 = vmatprep.subr.mxu0 %v972_v0  ;;  %v456_v14 = vlaneseq }
 0x17f   :  { %822 = vmatpush3.msra.mxu0 %v91_v38 }
 0x180   :  { %907 = vpow2.f32 %v344_v15  ;;  %823 = vmatprep.subr.mxu0 %v972_v0  ;;  %v457_v15 = vshrl.u32 %v456_v14, 7 }
 0x181   :  { %824 = vmatpush3.msra.mxu0 %v86_v39 }
 0x182   :  { %825 = vmatprep.subr.mxu0 %v972_v0  ;;  %v462_v19 = vsub.s32 1, %v457_v15  ;;  %v466_v33 = vsub.s32 2, %v457_v15 }
 0x183   :  { %826 = vmatpush3.msra.mxu0 %v81_v40 }
 0x184   :  { %827 = vmatprep.subr.mxu0 %v972_v0 }
 0x185   :  { %828 = vmatpush3.msra.mxu0 %v76_v41 }
 0x186   :  { %829 = vmatprep.subr.mxu0 %v972_v0 }
 0x187   :  { %830 = vmatpush3.msra.mxu0 %v71_v42 }
 0x188   :  { %831 = vmatprep.subr.mxu0 %v972_v0 }
 0x189   :  { %832 = vmatpush3.msra.mxu0 %v66_v43 }
 0x18a   :  { %833 = vmatprep.subr.mxu0 %v972_v0 }
 0x18b   :  { %834 = vmatpush3.msra.mxu0 %v61_v44 }
 0x18c   :  { %835 = vmatprep.subr.mxu0 %v972_v0 }
 0x18d   :  { %v1057_v16 = vpop.eup %907  ;;  %836 = vmatpush3.msra.mxu0 %v56_v45 }
 0x18e   :  { %v346_v17 = vsel %vm339_vm0, %v1057_v16, 0.0  ;;  %837 = vmatprep.subr.mxu0 %v972_v0 }
 0x18f   :  { %347 = vadd.xlane.f32.xlu0 %v346_v17  ;;  %838 = vmatpush3.msra.mxu0 %v51_v46  ;;  %v454_v17 = vld [vmem:[%s1212_s5] sm:$0x7] }
 0x190   :  { %840 = vmatmul.mubr.f32.vlgmr.msra.gmra.mxu0 %v1026_v36  ;;  %499 = vmatprep.subr.mxu0 %v452_v47  ;;  %v448_v36 = vld [vmem:[%s1211_s4 + $0x40] sm:$0xff]  ;;  %v463_v23 = vrot.slane %v454_v17, %v462_v19  ;;  %v467_v35 = vrot.slane %v454_v17, %v466_v33  ;;  %s974_s4 = smov 32  }
 0x191   :  { %500 = vmatpush1.msra.mxu0 %v451_v48  ;;  %539 = vmatprep.mubr.f32.mxu0 %v972_v0  ;;  %v641_v48 = vld [vmem:[%s1212_s5 + $0x3] sm:$0x1]  ;;  %s976_s5 = smov [#allocation6]  }
 0x192   :  { %501 = vmatprep.subr.mxu0 %v449_v49  ;;  %s749_s18 = sshll.u32 %s976_s5, 4  ;;  %s750_s18 = int_to_ptr.vmem [resolvable:$true] %s749_s18 }
 0x193   :  { %502 = vmatpush1.msra.mxu0 %v448_v36  ;;  %s945_s19 = scalar_lea.vmem %s750_s18, 16  ;;  %s949_s20 = scalar_lea.vmem %s750_s18, 32 }
 0x194   :  { %503 = vmatprep.subr.mxu0 %v446_v58  ;;  %p946_p5 = scmp.ne.s32.totalorder %s750_s18, %s945_s19  ;;  %p950_p6 = scmp.lt.s32.totalorder %s750_s18, %s750_s18 }
 0x195   :  { %504 = vmatpush1.msra.mxu0 %v445_v59  ;;  %p951_p7 = scmp.lt.s32.totalorder %s949_s20, %s945_s19 }
 0x196   :  { %505 = vmatprep.subr.mxu0 %v443_v61 }
 0x197   :  { %506 = vmatpush1.msra.mxu0 %v442_v62  ;;  %p952_p8 = por %p951_p7, %p950_p6 }
 0x198   :  { %888 = vmatprep.subr.mxu0 %v972_v0 }
 0x199   :  { %p953_p9 = pnand %p952_p8, %p946_p5 }
 0x218   :  { %v348_v50 = vpop.xlane.xlu0 %347 }
 0x219   :  { %909 = vrcp.f32 %v348_v50 }
 0x226   :  { %v910_v51 = vpop.eup %909 }
 0x227   :  { %v350_v52 = vmul.f32 %v910_v51, %v348_v50 }
 0x229   :  { %v351_v53 = vsub.f32 2.0, %v350_v52 }
 0x22b   :  { %v352_v54 = vmul.f32 %v910_v51, %v351_v53 }
 0x22d   :  { %v1136_v55 = vmul.f32 %v1057_v16, %v352_v54  ;;  %v458_v16 = vsub.s32 0, %v457_v15 }
 0x22f   :  { %875 = vmatmul.mubr.f32.vlgmr.msra.gmra.mxu1 %v1136_v55  ;;  %v459_v18 = vrot.slane %v454_v17, %v458_v16 }
 0x230   :  { %878 = vmatpush3.msra.mxu1 %v453_v56  ;;  %885 = vmatprep.mubr.msk.f32.mxu1 %vm973_vm1, %v972_v0 }
 0x231   :  { %879 = vmatprep.subr.mxu1 %v972_v0 }
 0x232   :  { %880 = vmatpush3.msra.mxu1 %v450_v57 }
 0x233   :  { %881 = vmatprep.subr.mxu1 %v972_v0 }
 0x234   :  { %882 = vmatpush3.msra.mxu1 %v447_v60 }
 0x235   :  { %883 = vmatprep.subr.mxu1 %v972_v0 }
 0x236   :  { %884 = vmatpush3.msra.mxu1 %v444_v63 }
 0x250   :  { %v335_v2 = vpop.f32.mrf.mxu0 }
 0x252   :  { %v841_v3 = vpop.f32.mrf.mxu0 }
 0x2ef   :  { %v436_v6 = vpop.f32.mrf.mxu1 }
 0x2f0   :  { %v440_v7 = vadd.f32 %v436_v6, %v195_v1 }
 0x2f1   :  { %v876_v8 = vpop.f32.mrf.mxu1 }
 0x2f2   :  { %v441_v9 = vmax.f32 %v440_v7, 0.0 }
 0x2f4   :  { %758 = vmatmul.mubr.msk.f32.vlgmr.msra.gmra.mxu0 %vm471_vm2, %v441_v9  ;;  %886 = vmatmul.mubr.msk.f32.vlgmr.msra.gmra.mxu1 %vm471_vm2, %v441_v9 }
 0x2f5   :  { %896 = vmatprep.mubr.msk.f32.mxu0 %vm973_vm1, %v972_v0  ;;  %889 = vmatpush3.msra.mxu0 %v640_v10 }
 0x2f6   :  { %890 = vmatprep.subr.mxu0 %v972_v0 }
 0x2f7   :  { %891 = vmatpush3.msra.mxu0 %v639_v11 }
 0x2f8   :  { %892 = vmatprep.subr.mxu0 %v972_v0 }
 0x2f9   :  { %893 = vmatpush3.msra.mxu0 %v638_v12 }
 0x2fa   :  { %894 = vmatprep.subr.mxu0 %v972_v0 }
 0x2fb   :  { %895 = vmatpush3.msra.mxu0 %v637_v13 }
 0x3b4   :  { %v541_v20 = vpop.f32.mrf.mxu0  ;;  %v612_v21 = vpop.f32.mrf.mxu1 }
 0x3b5   :  { %v542_v22 = vadd.f32 %v541_v20, %v459_v18  ;;  %v613_v39 = vadd.f32 %v612_v21, %v467_v35 }
 0x3b6   :  { %v543_v24 = vpop.f32.mrf.mxu0  ;;  %v887_v25 = vpop.f32.mrf.mxu1 }
 0x3b7   :  { %v616_v26 = vadd.f32 %v542_v22, %v264_v4  ;;  %v544_v28 = vadd.f32 %v543_v24, %v463_v23 }
 0x3b9   :  { %v760_v27 = vmul.f32 -1.442695, %v616_v26  ;;  %v623_v0 = vadd.f32 %v544_v28, %v266_v5 }
 0x3bb   :  { %911 = vpow2.f32 %v760_v27  ;;  %v761_v29 = vmul.f32 -1.442695, %v623_v0 }
 0x3bd   :  { %913 = vpow2.f32 %v761_v29 }
 0x3c8   :  { %v912_v30 = vpop.eup %911 }
 0x3c9   :  { %v620_v32 = vadd.f32 1.0, %v912_v30 }
 0x3ca   :  { %v914_v34 = vpop.eup %913 }
 0x3cb   :  { %915 = vrcp.f32 %v620_v32  ;;  %v627_v37 = vadd.f32 1.0, %v914_v34 }
 0x3cd   :  { %917 = vrcp.f32 %v627_v37 }
 0x3d8   :  { %v916_v38 = vpop.eup %915 }
 0x3d9   :  { %v630_v40 = vmul.f32 %v916_v38, %v335_v2 }
 0x3da   :  { %v918_v42 = vpop.eup %917 }
 0x3db   :  { %v631_v41 = vadd.f32 %v630_v40, %v613_v39  ;;  %v633_v43 = vsub.f32 1.0, %v918_v42  ;;  %v635_v46 = vmul.f32 %v918_v42, %v1020_v31 }
 0x3dd   :  { %919 = vtanh.f32 %v631_v41 }
 0x3ea   :  { %v920_v44 = vpop.eup %919 }
 0x3eb   :  { %v634_v45 = vmul.f32 %v920_v44, %v633_v43 }
 0x3ed   :  { %v636_v47 = vadd.f32 %v635_v46, %v634_v45 }
 0x3ef   :  { %731 = vrot.lane.b32.xlu0 %v636_v47, %s974_s4  ;;  %897 = vmatmul.mubr.msk.f32.vlgmr.msra.gmra.mxu0 %vm471_vm2, %v636_v47  ;;  %742 = vst.msk [vmem:[#allocation2] sm:$0x1] %vm715_vm3, %v636_v47 }
 0x461   :  { %v732_v63 = vpop.permute.xlu0 %731 }
 0x4af   :  { %v711_v49 = vpop.f32.mrf.mxu0 }
 0x4b0   :  { %v712_v50 = vadd.f32 %v711_v49, %v641_v48 }
 0x4b1   :  { %v898_v51 = vpop.f32.mrf.mxu0 }
 0x4b2   :  { %v716_v52 = vsel %vm715_vm3, %v712_v50, -inf }
 0x4b3   :  { %717 = vmax.xlane.f32.xlu1 %v716_v52 }
 0x53c   :  { %v718_v53 = vpop.xlane.xlu1 %717 }
 0x53d   :  { %v719_v31 = vsub.f32 %v712_v50, %v718_v53 }
 0x53f   :  { %v720_v54 = vmul.f32 1.442695, %v719_v31 }
 0x541   :  { %921 = vpow2.f32 %v720_v54 }
 0x54e   :  { %v922_v56 = vpop.eup %921 }
 0x54f   :  { %v722_v36 = vsel %vm715_vm3, %v922_v56, 0.0 }
 0x550   :  { %723 = vadd.xlane.f32.xlu1 %v722_v36 }
 0x561   :  { %737 = vrot.lane.b32.xlu1 %v1136_v55, %s975_s17 }
 0x5d9   :  { %v724_v57 = vpop.xlane.xlu1 %723 }
 0x5da   :  { %923 = vrcp.f32 %v724_v57 }
 0x5dd   :  { %v738_v1 = vpop.permute.xlu1 %737 }
 0x5e7   :  { %v924_v58 = vpop.eup %923 }
 0x5e8   :  { %v726_v59 = vmul.f32 %v924_v58, %v724_v57 }
 0x5ea   :  { %v727_v60 = vsub.f32 2.0, %v726_v59 }
 0x5ec   :  { %v728_v61 = vmul.f32 %v924_v58, %v727_v60 }
 0x5ee   :  { %v729_v62 = vmul.f32 %v922_v56, %v728_v61 }
 0x5f0   :  { %730 = vst.msk [vmem:[#allocation6] sm:$0x1] %vm715_vm3, %v729_v62 }
 0x5f1   :  { %735 = vst.msk [vmem:[#allocation6] sm:$0x1] %vm734_vm4, %v732_v63 }
 0x5f2   :  { %741 = vst.msk [vmem:[#allocation6] sm:$0x1] %vm740_vm5, %v738_v1 }
 0x5f3   :  { %956 = shalt.err (!%p953_p9)
}
 0x5f4   :  { %752 = dma.vmem_to_hbm [thread:$0]  %s750_s18, 16, %s1213_s6, [#allocation5]  }
 0x5f5   :  { %967 = dma.done.wait [#allocation5], 16  }
 0x5f6   :  { %968 = vsyncadd [#allocation5], 4294967280 }
 0x5f7   :  { %756 = vsyncpa [#allocation4], 1 }
 0x5f8   :  { %757 = vsyncpa [#allocation5], 1 }

</bundles_post_ra>
